<compile_context>
chip_gen: v6e
topology: v6e:2x2x1
jax: 0.10.0
libtpu: 0.0.40
codegen_flags: <defaults>
</compile_context>

<pallas_src>
import jax
import jax.numpy as jnp
from jax.experimental import pallas as pl
from jax.experimental.pallas import tpu as pltpu

BN_EPS = 1e-5  # PyTorch BatchNorm1d default


# ---------------------------------------------------------------------------
# Kernel bodies
# ---------------------------------------------------------------------------
def _mlp(xn_f32, w1, b1, w2, b2, w3, b3, w4, b4):
    """Shared 4-layer MLP tail: bf16 MXU matmuls, f32 accumulation / elementwise."""
    h = jnp.dot(xn_f32.astype(jnp.bfloat16), w1,
                preferred_element_type=jnp.float32) + b1
    h = jnp.maximum(h, 0.0)
    h = jnp.dot(h.astype(jnp.bfloat16), w2,
                preferred_element_type=jnp.float32) + b2
    h = jnp.maximum(h, 0.0)
    h = jnp.dot(h.astype(jnp.bfloat16), w3,
                preferred_element_type=jnp.float32) + b3
    h = jnp.maximum(h, 0.0)
    return jnp.dot(h.astype(jnp.bfloat16), w4,
                   preferred_element_type=jnp.float32) + b4


def net_tiled_kernel(scale_ref, shift_ref, x_ref,
                     w1_ref, b1_ref, w2_ref, b2_ref,
                     w3_ref, b3_ref, w4_ref, b4_ref,
                     out_ref):
    """Batch-tiled path: BN scale/shift precomputed (full-batch stats) in wrapper."""
    xn = x_ref[...] * scale_ref[...] + shift_ref[...]           # f32 normalize first
    out = _mlp(xn,
               w1_ref[...], b1_ref[...], w2_ref[...], b2_ref[...],
               w3_ref[...], b3_ref[...], w4_ref[...], b4_ref[...])
    out_ref[...] = out.astype(out_ref.dtype)                     # bf16 lane-dense store


def make_fused_bn_kernel(true_batch):
    """Single-step path: whole (padded) batch is in VMEM, so BatchNorm statistics are
    computed in-kernel; padded rows are masked out of the reduction."""
    inv_n = 1.0 / float(true_batch)

    def kernel(x_ref, gamma_ref, beta_ref,
               w1_ref, b1_ref, w2_ref, b2_ref,
               w3_ref, b3_ref, w4_ref, b4_ref,
               out_ref):
        x = x_ref[...]                                           # f32 [b_pad, feat]
        rows = jax.lax.broadcasted_iota(jnp.int32, (x.shape[0], 1), 0)
        valid = rows < true_batch
        mean = jnp.sum(jnp.where(valid, x, 0.0), axis=0, keepdims=True) * inv_n
        var = jnp.sum(jnp.where(valid, jnp.square(x - mean), 0.0),
                      axis=0, keepdims=True) * inv_n
        scale = gamma_ref[...] * jax.lax.rsqrt(var + BN_EPS)
        shift = beta_ref[...] - mean * scale
        xn = x * scale + shift                                   # f32 normalize
        out = _mlp(xn,
                   w1_ref[...], b1_ref[...], w2_ref[...], b2_ref[...],
                   w3_ref[...], b3_ref[...], w4_ref[...], b4_ref[...])
        out_ref[...] = out.astype(out_ref.dtype)

    return kernel


# ---------------------------------------------------------------------------
# Wrappers
# ---------------------------------------------------------------------------
def prepare_params(params):
    """One-time (per-model) weight preparation, hoisted out of the per-call path."""
    feat = params["w1"].shape[0]
    action_nums = params["w4"].shape[1]
    a_pad = max(128, pl.cdiv(action_nums, 128) * 128)
    w4_pad = jnp.zeros((params["w4"].shape[0], a_pad), jnp.float32)
    w4_pad = w4_pad.at[:, :action_nums].set(params["w4"])
    b4_pad = jnp.zeros((1, a_pad), jnp.float32).at[:, :action_nums].set(params["b4"])
    return {
        "feat": feat, "action_nums": action_nums, "a_pad": a_pad,
        "gamma": params["gamma"], "beta": params["beta"],
        "w1": params["w1"].astype(jnp.bfloat16), "b1": params["b1"],
        "w2": params["w2"].astype(jnp.bfloat16), "b2": params["b2"],
        "w3": params["w3"].astype(jnp.bfloat16), "b3": params["b3"],
        "w4": w4_pad.astype(jnp.bfloat16), "b4": b4_pad,
    }


def net_forward(x, prep, *, max_tile_b=512, fused_bn_max_batch=128):
    """x: [batch, feature_numbers] f32. prep: output of prepare_params()."""
    batch, feat = x.shape
    assert feat == prep["feat"]
    a_pad, action_nums = prep["a_pad"], prep["action_nums"]

    weight_args = (prep["w1"], prep["b1"], prep["w2"], prep["b2"],
                   prep["w3"], prep["b3"], prep["w4"], prep["b4"])
    weight_specs = [                                   # constant index maps: resident
        pl.BlockSpec((feat, 128), lambda i: (0, 0)),
        pl.BlockSpec((1, 128), lambda i: (0, 0)),
        pl.BlockSpec((128, 256), lambda i: (0, 0)),
        pl.BlockSpec((1, 256), lambda i: (0, 0)),
        pl.BlockSpec((256, 128), lambda i: (0, 0)),
        pl.BlockSpec((1, 128), lambda i: (0, 0)),
        pl.BlockSpec((128, a_pad), lambda i: (0, 0)),
        pl.BlockSpec((1, a_pad), lambda i: (0, 0)),
    ]
    layer_flops = 2 * (feat * 128 + 128 * 256 + 256 * 128 + 128 * a_pad)
    weight_bytes = (2 * (feat * 128 + 128 * 256 + 256 * 128 + 128 * a_pad)
                    + 4 * (128 + 256 + 128 + a_pad))

    if batch <= fused_bn_max_batch:
        # ---- single pallas_call: BN statistics computed in-kernel ----------------
        b_pad = pl.cdiv(batch, 8) * 8
        x_p = x if b_pad == batch else jnp.zeros((b_pad, feat), x.dtype).at[:batch].set(x)
        out = pl.pallas_call(
            make_fused_bn_kernel(batch),
            out_shape=jax.ShapeDtypeStruct((b_pad, a_pad), jnp.bfloat16),
            grid=(1,),
            in_specs=[pl.BlockSpec((b_pad, feat), lambda i: (0, 0)),
                      pl.BlockSpec((1, feat), lambda i: (0, 0)),
                      pl.BlockSpec((1, feat), lambda i: (0, 0))] + weight_specs,
            out_specs=pl.BlockSpec((b_pad, a_pad), lambda i: (0, 0)),
            compiler_params=pltpu.CompilerParams(
                dimension_semantics=("arbitrary",)),
            cost_estimate=pl.CostEstimate(
                flops=b_pad * layer_flops, transcendentals=feat,
                bytes_accessed=b_pad * feat * 4 + b_pad * a_pad * 2 + weight_bytes),
        )(x_p, prep["gamma"], prep["beta"], *weight_args)
    else:
        # ---- tiled path: full-batch scale/shift in wrapper, >= 2 grid steps ------
        mean = jnp.mean(x, axis=0, keepdims=True)
        var = jnp.mean(jnp.square(x - mean), axis=0, keepdims=True)
        scale = prep["gamma"] * jax.lax.rsqrt(var + BN_EPS)      # [1, feat] f32
        shift = prep["beta"] - mean * scale                      # [1, feat] f32

        # >= 2 grid steps so v7x megacore can shard the batch; tile cap keeps the
        # f32 intermediates / out blocks tiny vs. every chip's VMEM budget.
        tile_b = min(max_tile_b, pl.cdiv(pl.cdiv(batch, 2), 16) * 16)
        b_pad = pl.cdiv(batch, tile_b) * tile_b
        x_p = x if b_pad == batch else jnp.zeros((b_pad, feat), x.dtype).at[:batch].set(x)
        grid = (b_pad // tile_b,)

        out = pl.pallas_call(
            net_tiled_kernel,
            out_shape=jax.ShapeDtypeStruct((b_pad, a_pad), jnp.bfloat16),
            grid=grid,
            in_specs=[pl.BlockSpec((1, feat), lambda i: (0, 0)),
                      pl.BlockSpec((1, feat), lambda i: (0, 0)),
                      pl.BlockSpec((tile_b, feat), lambda i: (i, 0))] + weight_specs,
            out_specs=pl.BlockSpec((tile_b, a_pad), lambda i: (i, 0)),
            compiler_params=pltpu.CompilerParams(
                dimension_semantics=("parallel",)),
            cost_estimate=pl.CostEstimate(
                flops=b_pad * layer_flops, transcendentals=0,
                bytes_accessed=b_pad * feat * 4 + b_pad * a_pad * 2 + weight_bytes),
        )(scale, shift, x_p, *weight_args)

    return out[:batch, :action_nums].astype(jnp.float32)


# ---------------------------------------------------------------------------
# Parameters & pure-JAX reference
# ---------------------------------------------------------------------------
def init_params(key, feature_numbers, action_nums):
    """Deterministic synthetic parameters matching the PyTorch module shapes.
    Linear weights stored transposed as [in, out] so the hot path is x @ W."""
    neuron_nums = [128, 256, 128]
    dims = [feature_numbers] + neuron_nums + [action_nums]
    params = {
        # BatchNorm1d init per the module: weight=1, bias=0
        "gamma": jnp.ones((1, feature_numbers), jnp.float32),
        "beta": jnp.zeros((1, feature_numbers), jnp.float32),
    }
    keys = jax.random.split(key, 8)
    for i in range(4):
        in_d, out_d = dims[i], dims[i + 1]
        bound = 1.0 / (in_d ** 0.5)  # PyTorch nn.Linear default init range
        w = jax.random.uniform(keys[2 * i], (in_d, out_d), jnp.float32, -bound, bound)
        b = jax.random.uniform(keys[2 * i + 1], (1, out_d), jnp.float32, -bound, bound)
        params[f"w{i + 1}"] = w
        params[f"b{i + 1}"] = b
    return params


def net_reference(x, params):
    """Pure-JAX f32 reference matching PyTorch semantics (train-mode BN)."""
    mean = jnp.mean(x, axis=0, keepdims=True)
    var = jnp.mean((x - mean) ** 2, axis=0, keepdims=True)
    y = (x - mean) / jnp.sqrt(var + BN_EPS) * params["gamma"] + params["beta"]
    h = jnp.maximum(y @ params["w1"] + params["b1"], 0.0)
    h = jnp.maximum(h @ params["w2"] + params["b2"], 0.0)
    h = jnp.maximum(h @ params["w3"] + params["b3"], 0.0)
    return h @ params["w4"] + params["b4"]


if __name__ == "__main__":
    feature_numbers = 16
    action_nums = 4

    key = jax.random.PRNGKey(0)
    k_small, k_big, k_p = jax.random.split(key, 3)
    params = init_params(k_p, feature_numbers, action_nums)
    prep = prepare_params(params)        # one-time weight prep (hoisted out of hot path)

    # Small batch -> fused-BN single-step kernel (DQN act()-style path).
    x_small = jax.random.normal(k_small, (32, feature_numbers), jnp.float32)
    out_small = jax.block_until_ready(net_forward(x_small, prep))
    ref_small = net_reference(x_small, params)
    assert out_small.shape == (32, action_nums)
    assert jnp.allclose(out_small, ref_small, atol=3e-2, rtol=3e-2), \
        "fused-BN path mismatch vs reference"

    # Larger batch -> tiled path: 2 grid steps of 128 rows (megacore-friendly).
    x_big = jax.random.normal(k_big, (256, feature_numbers), jnp.float32)
    out_big = jax.block_until_ready(net_forward(x_big, prep))
    ref_big = net_reference(x_big, params)
    assert out_big.shape == (256, action_nums)
    assert jnp.allclose(out_big, ref_big, atol=3e-2, rtol=3e-2), \
        "tiled path mismatch vs reference"

    print("KERNEL_OK")
</pallas_src>

<mosaic_0001>
module attributes {stable_mosaic.version = 11 : i64} {
  func.func @kernel(%arg0: i32, %arg1: memref<32x16xf32, #tpu.memory_space<vmem>>, %arg2: memref<1x16xf32, #tpu.memory_space<vmem>>, %arg3: memref<1x16xf32, #tpu.memory_space<vmem>>, %arg4: memref<16x128xbf16, #tpu.memory_space<vmem>>, %arg5: memref<1x128xf32, #tpu.memory_space<vmem>>, %arg6: memref<128x256xbf16, #tpu.memory_space<vmem>>, %arg7: memref<1x256xf32, #tpu.memory_space<vmem>>, %arg8: memref<256x128xbf16, #tpu.memory_space<vmem>>, %arg9: memref<1x128xf32, #tpu.memory_space<vmem>>, %arg10: memref<128x128xbf16, #tpu.memory_space<vmem>>, %arg11: memref<1x128xf32, #tpu.memory_space<vmem>>, %arg12: memref<32x128xbf16, #tpu.memory_space<vmem>>) attributes {dimension_semantics = [#tpu.dimension_semantics<arbitrary>], iteration_bounds = array<i64: 1>, scalar_prefetch = 0 : i64, scratch_operands = 0 : i64, tpu.core_type = #tpu.core_type<tc>, window_params = [{pipeline_mode = #tpu.pipeline_mode<synchronous>, transform_indices = @transform_0, window_bounds = array<i64: 32, 16>}, {pipeline_mode = #tpu.pipeline_mode<synchronous>, transform_indices = @transform_1, window_bounds = array<i64: 1, 16>}, {pipeline_mode = #tpu.pipeline_mode<synchronous>, transform_indices = @transform_2, window_bounds = array<i64: 1, 16>}, {pipeline_mode = #tpu.pipeline_mode<synchronous>, transform_indices = @transform_3, window_bounds = array<i64: 16, 128>}, {pipeline_mode = #tpu.pipeline_mode<synchronous>, transform_indices = @transform_4, window_bounds = array<i64: 1, 128>}, {pipeline_mode = #tpu.pipeline_mode<synchronous>, transform_indices = @transform_5, window_bounds = array<i64: 128, 256>}, {pipeline_mode = #tpu.pipeline_mode<synchronous>, transform_indices = @transform_6, window_bounds = array<i64: 1, 256>}, {pipeline_mode = #tpu.pipeline_mode<synchronous>, transform_indices = @transform_7, window_bounds = array<i64: 256, 128>}, {pipeline_mode = #tpu.pipeline_mode<synchronous>, transform_indices = @transform_8, window_bounds = array<i64: 1, 128>}, {pipeline_mode = #tpu.pipeline_mode<synchronous>, transform_indices = @transform_9, window_bounds = array<i64: 128, 128>}, {pipeline_mode = #tpu.pipeline_mode<synchronous>, transform_indices = @transform_10, window_bounds = array<i64: 1, 128>}, {pipeline_mode = #tpu.pipeline_mode<synchronous>, transform_indices = @transform_11, window_bounds = array<i64: 32, 128>}]} {
    %c0 = arith.constant 0 : index
    %c0_0 = arith.constant 0 : index
    %0 = vector.load %arg1[%c0, %c0_0] : memref<32x16xf32, #tpu.memory_space<vmem>>, vector<32x16xf32>
    %1 = tpu.iota {dimensions = array<i32: 0>} : vector<32x1xi32>
    %c32_i32 = arith.constant 32 : i32
    %2 = vector.broadcast %c32_i32 : i32 to vector<32x1xi32>
    %3 = arith.cmpi slt, %1, %2 : vector<32x1xi32>
    %cst = arith.constant 0.000000e+00 : f32
    %4 = vector.shape_cast %3 : vector<32x1xi1> to vector<32x1xi1>
    %5 = vector.broadcast %4 : vector<32x1xi1> to vector<32x16xi1>
    %6 = vector.broadcast %cst : f32 to vector<32x16xf32>
    %7 = arith.select %5, %0, %6 : vector<32x16xi1>, vector<32x16xf32>
    %cst_1 = arith.constant dense<0.000000e+00> : vector<16xf32>
    %8 = vector.multi_reduction <add>, %7, %cst_1 [0] : vector<32x16xf32> to vector<16xf32>
    %9 = vector.shape_cast %8 : vector<16xf32> to vector<1x16xf32>
    %cst_2 = arith.constant 3.125000e-02 : f32
    %10 = vector.broadcast %cst_2 : f32 to vector<1x16xf32>
    %11 = arith.mulf %9, %10 : vector<1x16xf32>
    %12 = vector.broadcast %11 : vector<1x16xf32> to vector<32x16xf32>
    %13 = arith.subf %0, %12 : vector<32x16xf32>
    %14 = arith.mulf %13, %13 : vector<32x16xf32>
    %cst_3 = arith.constant 0.000000e+00 : f32
    %15 = vector.shape_cast %3 : vector<32x1xi1> to vector<32x1xi1>
    %16 = vector.broadcast %15 : vector<32x1xi1> to vector<32x16xi1>
    %17 = vector.broadcast %cst_3 : f32 to vector<32x16xf32>
    %18 = arith.select %16, %14, %17 : vector<32x16xi1>, vector<32x16xf32>
    %cst_4 = arith.constant dense<0.000000e+00> : vector<16xf32>
    %19 = vector.multi_reduction <add>, %18, %cst_4 [0] : vector<32x16xf32> to vector<16xf32>
    %20 = vector.shape_cast %19 : vector<16xf32> to vector<1x16xf32>
    %cst_5 = arith.constant 3.125000e-02 : f32
    %21 = vector.broadcast %cst_5 : f32 to vector<1x16xf32>
    %22 = arith.mulf %20, %21 : vector<1x16xf32>
    %c0_6 = arith.constant 0 : index
    %c0_7 = arith.constant 0 : index
    %23 = vector.load %arg2[%c0_6, %c0_7] : memref<1x16xf32, #tpu.memory_space<vmem>>, vector<1x16xf32>
    %cst_8 = arith.constant 9.99999974E-6 : f32
    %24 = vector.broadcast %cst_8 : f32 to vector<1x16xf32>
    %25 = arith.addf %22, %24 : vector<1x16xf32>
    %26 = math.rsqrt %25 : vector<1x16xf32>
    %27 = arith.mulf %23, %26 : vector<1x16xf32>
    %c0_9 = arith.constant 0 : index
    %c0_10 = arith.constant 0 : index
    %28 = vector.load %arg3[%c0_9, %c0_10] : memref<1x16xf32, #tpu.memory_space<vmem>>, vector<1x16xf32>
    %29 = arith.mulf %11, %27 : vector<1x16xf32>
    %30 = arith.subf %28, %29 : vector<1x16xf32>
    %31 = vector.broadcast %27 : vector<1x16xf32> to vector<32x16xf32>
    %32 = arith.mulf %0, %31 : vector<32x16xf32>
    %33 = vector.broadcast %30 : vector<1x16xf32> to vector<32x16xf32>
    %34 = arith.addf %32, %33 : vector<32x16xf32>
    %c0_11 = arith.constant 0 : index
    %c0_12 = arith.constant 0 : index
    %35 = vector.load %arg4[%c0_11, %c0_12] : memref<16x128xbf16, #tpu.memory_space<vmem>>, vector<16x128xbf16>
    %c0_13 = arith.constant 0 : index
    %c0_14 = arith.constant 0 : index
    %36 = vector.load %arg5[%c0_13, %c0_14] : memref<1x128xf32, #tpu.memory_space<vmem>>, vector<1x128xf32>
    %c0_15 = arith.constant 0 : index
    %c0_16 = arith.constant 0 : index
    %37 = vector.load %arg6[%c0_15, %c0_16] : memref<128x256xbf16, #tpu.memory_space<vmem>>, vector<128x256xbf16>
    %c0_17 = arith.constant 0 : index
    %c0_18 = arith.constant 0 : index
    %38 = vector.load %arg7[%c0_17, %c0_18] : memref<1x256xf32, #tpu.memory_space<vmem>>, vector<1x256xf32>
    %c0_19 = arith.constant 0 : index
    %c0_20 = arith.constant 0 : index
    %39 = vector.load %arg8[%c0_19, %c0_20] : memref<256x128xbf16, #tpu.memory_space<vmem>>, vector<256x128xbf16>
    %c0_21 = arith.constant 0 : index
    %c0_22 = arith.constant 0 : index
    %40 = vector.load %arg9[%c0_21, %c0_22] : memref<1x128xf32, #tpu.memory_space<vmem>>, vector<1x128xf32>
    %c0_23 = arith.constant 0 : index
    %c0_24 = arith.constant 0 : index
    %41 = vector.load %arg10[%c0_23, %c0_24] : memref<128x128xbf16, #tpu.memory_space<vmem>>, vector<128x128xbf16>
    %c0_25 = arith.constant 0 : index
    %c0_26 = arith.constant 0 : index
    %42 = vector.load %arg11[%c0_25, %c0_26] : memref<1x128xf32, #tpu.memory_space<vmem>>, vector<1x128xf32>
    %43 = arith.truncf %34 : vector<32x16xf32> to vector<32x16xbf16>
    %cst_27 = arith.constant dense<0.000000e+00> : vector<32x128xf32>
    %44 = tpu.matmul %43, %35, %cst_27 {dimension_numbers = #tpu.dot_dimension_numbers<[1], [0], [0], [1], [0, 0, 1, 1], [], []>} : vector<32x16xbf16>, vector<16x128xbf16>, vector<32x128xf32> -> vector<32x128xf32>
    %45 = vector.broadcast %36 : vector<1x128xf32> to vector<32x128xf32>
    %46 = arith.addf %44, %45 : vector<32x128xf32>
    %cst_28 = arith.constant 0.000000e+00 : f32
    %47 = vector.broadcast %cst_28 : f32 to vector<32x128xf32>
    %48 = arith.maximumf %46, %47 : vector<32x128xf32>
    %49 = arith.truncf %48 : vector<32x128xf32> to vector<32x128xbf16>
    %cst_29 = arith.constant dense<0.000000e+00> : vector<32x256xf32>
    %50 = tpu.matmul %49, %37, %cst_29 {dimension_numbers = #tpu.dot_dimension_numbers<[1], [0], [0], [1], [0, 0, 1, 1], [], []>} : vector<32x128xbf16>, vector<128x256xbf16>, vector<32x256xf32> -> vector<32x256xf32>
    %51 = vector.broadcast %38 : vector<1x256xf32> to vector<32x256xf32>
    %52 = arith.addf %50, %51 : vector<32x256xf32>
    %cst_30 = arith.constant 0.000000e+00 : f32
    %53 = vector.broadcast %cst_30 : f32 to vector<32x256xf32>
    %54 = arith.maximumf %52, %53 : vector<32x256xf32>
    %55 = arith.truncf %54 : vector<32x256xf32> to vector<32x256xbf16>
    %cst_31 = arith.constant dense<0.000000e+00> : vector<32x128xf32>
    %56 = tpu.matmul %55, %39, %cst_31 {dimension_numbers = #tpu.dot_dimension_numbers<[1], [0], [0], [1], [0, 0, 1, 1], [], []>} : vector<32x256xbf16>, vector<256x128xbf16>, vector<32x128xf32> -> vector<32x128xf32>
    %57 = vector.broadcast %40 : vector<1x128xf32> to vector<32x128xf32>
    %58 = arith.addf %56, %57 : vector<32x128xf32>
    %cst_32 = arith.constant 0.000000e+00 : f32
    %59 = vector.broadcast %cst_32 : f32 to vector<32x128xf32>
    %60 = arith.maximumf %58, %59 : vector<32x128xf32>
    %61 = arith.truncf %60 : vector<32x128xf32> to vector<32x128xbf16>
    %cst_33 = arith.constant dense<0.000000e+00> : vector<32x128xf32>
    %62 = tpu.matmul %61, %41, %cst_33 {dimension_numbers = #tpu.dot_dimension_numbers<[1], [0], [0], [1], [0, 0, 1, 1], [], []>} : vector<32x128xbf16>, vector<128x128xbf16>, vector<32x128xf32> -> vector<32x128xf32>
    %63 = vector.broadcast %42 : vector<1x128xf32> to vector<32x128xf32>
    %64 = arith.addf %62, %63 : vector<32x128xf32>
    %65 = arith.truncf %64 : vector<32x128xf32> to vector<32x128xbf16>
    %c0_34 = arith.constant 0 : index
    %c0_35 = arith.constant 0 : index
    %66 = vector.load %arg12[%c0_34, %c0_35] : memref<32x128xbf16, #tpu.memory_space<vmem>>, vector<32x128xbf16>
    tpu.vector_store %arg12[%c0_34, %c0_35], %65 {strides = array<i32>} : memref<32x128xbf16, #tpu.memory_space<vmem>>, vector<32x128xbf16>,
    return
  }
  func.func @transform_0(%arg0: i32) -> (i32, i32) {
    %c0_i32 = arith.constant 0 : i32
    %c0_i32_0 = arith.constant 0 : i32
    %c0_i32_1 = arith.constant 0 : i32
    return %c0_i32, %c0_i32_0 : i32, i32
  }
  func.func @transform_1(%arg0: i32) -> (i32, i32) {
    %c0_i32 = arith.constant 0 : i32
    %c0_i32_0 = arith.constant 0 : i32
    %c0_i32_1 = arith.constant 0 : i32
    return %c0_i32, %c0_i32_0 : i32, i32
  }
  func.func @transform_2(%arg0: i32) -> (i32, i32) {
    %c0_i32 = arith.constant 0 : i32
    %c0_i32_0 = arith.constant 0 : i32
    %c0_i32_1 = arith.constant 0 : i32
    return %c0_i32, %c0_i32_0 : i32, i32
  }
  func.func @transform_3(%arg0: i32) -> (i32, i32) {
    %c0_i32 = arith.constant 0 : i32
    %c0_i32_0 = arith.constant 0 : i32
    %c0_i32_1 = arith.constant 0 : i32
    return %c0_i32, %c0_i32_0 : i32, i32
  }
  func.func @transform_4(%arg0: i32) -> (i32, i32) {
    %c0_i32 = arith.constant 0 : i32
    %c0_i32_0 = arith.constant 0 : i32
    %c0_i32_1 = arith.constant 0 : i32
    return %c0_i32, %c0_i32_0 : i32, i32
  }
  func.func @transform_5(%arg0: i32) -> (i32, i32) {
    %c0_i32 = arith.constant 0 : i32
    %c0_i32_0 = arith.constant 0 : i32
    %c0_i32_1 = arith.constant 0 : i32
    return %c0_i32, %c0_i32_0 : i32, i32
  }
  func.func @transform_6(%arg0: i32) -> (i32, i32) {
    %c0_i32 = arith.constant 0 : i32
    %c0_i32_0 = arith.constant 0 : i32
    %c0_i32_1 = arith.constant 0 : i32
    return %c0_i32, %c0_i32_0 : i32, i32
  }
  func.func @transform_7(%arg0: i32) -> (i32, i32) {
    %c0_i32 = arith.constant 0 : i32
    %c0_i32_0 = arith.constant 0 : i32
    %c0_i32_1 = arith.constant 0 : i32
    return %c0_i32, %c0_i32_0 : i32, i32
  }
  func.func @transform_8(%arg0: i32) -> (i32, i32) {
    %c0_i32 = arith.constant 0 : i32
    %c0_i32_0 = arith.constant 0 : i32
    %c0_i32_1 = arith.constant 0 : i32
    return %c0_i32, %c0_i32_0 : i32, i32
  }
  func.func @transform_9(%arg0: i32) -> (i32, i32) {
    %c0_i32 = arith.constant 0 : i32
    %c0_i32_0 = arith.constant 0 : i32
    %c0_i32_1 = arith.constant 0 : i32
    return %c0_i32, %c0_i32_0 : i32, i32
  }
  func.func @transform_10(%arg0: i32) -> (i32, i32) {
    %c0_i32 = arith.constant 0 : i32
    %c0_i32_0 = arith.constant 0 : i32
    %c0_i32_1 = arith.constant 0 : i32
    return %c0_i32, %c0_i32_0 : i32, i32
  }
  func.func @transform_11(%arg0: i32) -> (i32, i32) {
    %c0_i32 = arith.constant 0 : i32
    %c0_i32_0 = arith.constant 0 : i32
    %c0_i32_1 = arith.constant 0 : i32
    return %c0_i32, %c0_i32_0 : i32, i32
  }
}

</mosaic_0001>

<bundles_post_ra>
// kernel: tpu_custom_call.1
= control target key start
LH: loop header
LB: loop body
LE: loop exit
PB: predicated region body
PF: predicated region fallthrough
CT: control target
= control target key end

     0   :  { %16 = vsyncpa [#allocation3], 0  ;;  %s1411_s0 = inlined_call_operand.vmem [shape: f32[32,16], index: 0, kind: input, shape index: {}]   ;;  %s1412_s1 = inlined_call_operand.hbm [shape: f32[1,16], index: 1, kind: input, shape index: {}]   ;;  %s1413_s2 = inlined_call_operand.hbm [shape: f32[1,16], index: 2, kind: input, shape index: {}]   ;;  %s1414_s3 = inlined_call_operand.hbm [shape: bf16[16,128], index: 3, kind: input, shape index: {}]   ;;  %s1415_s4 = inlined_call_operand.hbm [shape: f32[1,128], index: 4, kind: input, shape index: {}]   ;;  %s1416_s5 = inlined_call_operand.hbm [shape: bf16[128,256], index: 5, kind: input, shape index: {}]   ;;  %s1417_s6 = inlined_call_operand.hbm [shape: f32[1,256], index: 6, kind: input, shape index: {}]   ;;  %s1418_s7 = inlined_call_operand.hbm [shape: bf16[256,128], index: 7, kind: input, shape index: {}]   ;;  %s1419_s8 = inlined_call_operand.hbm [shape: f32[1,128], index: 8, kind: input, shape index: {}]   ;;  %s1420_s9 = inlined_call_operand.vmem [shape: bf16[128,128], index: 9, kind: input, shape index: {}]   ;;  %s1421_s10 = inlined_call_operand.vmem [shape: f32[1,128], index: 10, kind: input, shape index: {}]   ;;  %s1422_s11 = inlined_call_operand.hbm [shape: bf16[32,128], index: 11, kind: output, shape index: {}]  }
   0x1   :  { %17 = vsyncpa [#allocation6], 0 }
   0x2   :  { %18 = vsyncpa [#allocation9], 0 }
   0x3   :  { %19 = vsyncpa [#allocation12], 0 }
   0x4   :  { %20 = vsyncpa [#allocation15], 0 }
   0x5   :  { %21 = vsyncpa [#allocation4], 0  ;;  %s1223_s17 = smov [#allocation5]   ;;  %s1224_s19 = smov [#allocation8]  }
   0x6   :  { %s40_s18 = sshll.u32 %s1223_s17, 4  ;;  %s62_s20 = sshll.u32 %s1224_s19, 4  ;;  %s41_s18 = int_to_ptr.vmem [resolvable:$true] %s40_s18  ;;  %s63_s20 = int_to_ptr.vmem [resolvable:$true] %s62_s20 }
   0x7   :  { %s1039_s21 = scalar_lea.vmem %s41_s18, 16  ;;  %s1043_s22 = scalar_lea.vmem %s41_s18, 32 }
   0x8   :  { %p1040_p0 = scmp.ne.s32.totalorder %s41_s18, %s1039_s21  ;;  %p1044_p1 = scmp.lt.s32.totalorder %s41_s18, %s41_s18 }
   0x9   :  { %p1045_p2 = scmp.lt.s32.totalorder %s1043_s22, %s1039_s21 }
   0xb   :  { %p1046_p3 = por %p1045_p2, %p1044_p1 }
   0xd   :  { %p1047_p4 = pnand %p1046_p3, %p1040_p0 }
   0xf   :  { %1050 = shalt.err (!%p1047_p4)
}
  0x10   :  { %43 = dma.hbm_to_vmem [thread:$0]  %s1413_s2, 16, %s41_s18, [#allocation6]  }
  0x11   :  { %s1059_s25 = scalar_lea.vmem %s63_s20, 16  ;;  %s1063_s26 = scalar_lea.vmem %s63_s20, 32 }
  0x12   :  { %p1060_p5 = scmp.ne.s32.totalorder %s63_s20, %s1059_s25  ;;  %p1064_p6 = scmp.lt.s32.totalorder %s63_s20, %s63_s20 }
  0x13   :  { %p1065_p7 = scmp.lt.s32.totalorder %s1063_s26, %s1059_s25 }
  0x15   :  { %p1066_p8 = por %p1065_p7, %p1064_p6 }
  0x17   :  { %p1067_p9 = pnand %p1066_p8, %p1060_p5 }
  0x19   :  { %1070 = shalt.err (!%p1067_p9)
}
  0x1a   :  { %65 = dma.hbm_to_vmem [thread:$0]  %s1415_s4, 16, %s63_s20, [#allocation9]  }
  0x1b   :  { %s1225_s29 = smov [#allocation11]   ;;  %s1226_s12 = smov [#allocation2]  }
  0x1c   :  { %s84_s30 = sshll.u32 %s1225_s29, 4  ;;  %s30_s13 = sshll.u32 %s1226_s12, 4  ;;  %s85_s30 = int_to_ptr.vmem [resolvable:$true] %s84_s30  ;;  %s31_s13 = int_to_ptr.vmem [resolvable:$true] %s30_s13 }
  0x1d   :  { %s1079_s14 = scalar_lea.vmem %s85_s30, 32  ;;  %p1084_p11 = scmp.lt.s32.totalorder %s85_s30, %s85_s30 }
  0x1e   :  { %p1080_p10 = scmp.ne.s32.totalorder %s85_s30, %s1079_s14  ;;  %p1085_p12 = scmp.lt.s32.totalorder %s1079_s14, %s1079_s14 }
  0x20   :  { %p1086_p13 = por %p1085_p12, %p1084_p11 }
  0x22   :  { %p1087_p0 = pnand %p1086_p13, %p1080_p10 }
  0x24   :  { %1090 = shalt.err (!%p1087_p0)
}
  0x25   :  { %87 = dma.hbm_to_vmem [thread:$0]  %s1417_s6, 32, %s85_s30, [#allocation12]  }
  0x26   :  { %s1099_s16 = scalar_lea.vmem %s31_s13, 16  ;;  %s1103_s4 = scalar_lea.vmem %s31_s13, 32 }
  0x27   :  { %p1100_p1 = scmp.ne.s32.totalorder %s31_s13, %s1099_s16  ;;  %p1104_p2 = scmp.lt.s32.totalorder %s31_s13, %s31_s13 }
  0x28   :  { %p1105_p3 = scmp.lt.s32.totalorder %s1103_s4, %s1099_s16 }
  0x2a   :  { %p1106_p4 = por %p1105_p3, %p1104_p2 }
  0x2c   :  { %p1107_p5 = pnand %p1106_p4, %p1100_p1 }
  0x2e   :  { %1110 = shalt.err (!%p1107_p5)
}
  0x2f   :  { %33 = dma.hbm_to_vmem [thread:$0]  %s1412_s1, 16, %s31_s13, [#allocation3]  }
  0x30   :  { %s1227_s19 = smov [#allocation7]  }
  0x31   :  { %s49_s20 = sshll.u32 %s1227_s19, 4  ;;  %s50_s20 = int_to_ptr.vmem [resolvable:$true] %s49_s20 }
  0x32   :  { %s1119_s21 = scalar_lea.vmem %s50_s20, 128  ;;  %p1124_p7 = scmp.lt.s32.totalorder %s50_s20, %s50_s20 }
  0x33   :  { %p1120_p6 = scmp.ne.s32.totalorder %s50_s20, %s1119_s21  ;;  %p1125_p8 = scmp.lt.s32.totalorder %s1119_s21, %s1119_s21 }
  0x35   :  { %p1126_p9 = por %p1125_p8, %p1124_p7 }
  0x37   :  { %p1127_p10 = pnand %p1126_p9, %p1120_p6 }
  0x39   :  { %1130 = shalt.err (!%p1127_p10)
}
  0x3a   :  { %s1228_s6 = smov 64   ;;  %s1229_s22 = smov 4  }
  0x3b   :  { %55 = dma.hbm_to_vmem [thread:$0]  %s1414_s3, 128, %s50_s20, [#allocation6], %s1228_s6, %s1228_s6, %s1229_s22  }
  0x3c   :  { %s1230_s1 = smov [#allocation10]  }
  0x3d   :  { %s71_s25 = sshll.u32 %s1230_s1, 4  ;;  %s72_s25 = int_to_ptr.vmem [resolvable:$true] %s71_s25 }
  0x3e   :  { %s1139_s26 = scalar_lea.vmem %s72_s25, 2048  ;;  %p1144_p12 = scmp.lt.s32.totalorder %s72_s25, %s72_s25 }
  0x3f   :  { %p1140_p11 = scmp.ne.s32.totalorder %s72_s25, %s1139_s26  ;;  %p1145_p13 = scmp.lt.s32.totalorder %s1139_s26, %s1139_s26 }
  0x41   :  { %p1146_p0 = por %p1145_p13, %p1144_p12 }
  0x43   :  { %p1147_p1 = pnand %p1146_p0, %p1140_p11 }
  0x45   :  { %1150 = shalt.err (!%p1147_p1)
}
  0x46   :  { %s1231_s27 = smov 128   ;;  %s1232_s28 = smov 8  }
  0x47   :  { %77 = dma.hbm_to_vmem [thread:$0]  %s1416_s5, 2048, %s72_s25, [#allocation9], %s1231_s27, %s1231_s27, %s1232_s28  }
  0x48   :  { %s1233_s12 = smov [#allocation13]   ;;  %s1234_s14 = smov [#allocation14]  }
  0x49   :  { %s93_s13 = sshll.u32 %s1233_s12, 4  ;;  %s106_s3 = sshll.u32 %s1234_s14, 4  ;;  %s94_s13 = int_to_ptr.vmem [resolvable:$true] %s93_s13  ;;  %s107_s3 = int_to_ptr.vmem [resolvable:$true] %s106_s3 }
  0x4a   :  { %s1159_s2 = scalar_lea.vmem %s94_s13, 2048  ;;  %p1164_p3 = scmp.lt.s32.totalorder %s94_s13, %s94_s13 }
  0x4b   :  { %p1160_p2 = scmp.ne.s32.totalorder %s94_s13, %s1159_s2  ;;  %p1165_p4 = scmp.lt.s32.totalorder %s1159_s2, %s1159_s2 }
  0x4d   :  { %p1166_p5 = por %p1165_p4, %p1164_p3 }
  0x4f   :  { %p1167_p6 = pnand %p1166_p5, %p1160_p2 }
  0x51   :  { %1170 = shalt.err (!%p1167_p6)
}
  0x52   :  { %99 = dma.hbm_to_vmem [thread:$0]  %s1418_s7, 2048, %s94_s13, [#allocation12], %s1228_s6, %s1228_s6, %s1229_s22  }
  0x53   :  { %s1179_s5 = scalar_lea.vmem %s107_s3, 16  ;;  %s1183_s4 = scalar_lea.vmem %s107_s3, 32 }
  0x54   :  { %p1180_p7 = scmp.ne.s32.totalorder %s107_s3, %s1179_s5  ;;  %p1184_p8 = scmp.lt.s32.totalorder %s107_s3, %s107_s3 }
  0x55   :  { %p1185_p9 = scmp.lt.s32.totalorder %s1183_s4, %s1179_s5 }
  0x57   :  { %p1186_p10 = por %p1185_p9, %p1184_p8 }
  0x59   :  { %p1187_p11 = pnand %p1186_p10, %p1180_p7 }
  0x5b   :  { %1190 = shalt.err (!%p1187_p11)
}
  0x5c   :  { %109 = dma.hbm_to_vmem [thread:$0]  %s1419_s8, 16, %s107_s3, [#allocation15]  }
  0x5d   :  { %1211 = dma.done.wait [#allocation3], 16  }
  0x5e   :  { %1212 = vsyncadd [#allocation3], 4294967280 }
  0x5f   :  { %1213 = dma.done.wait [#allocation6], 144  }
  0x60   :  { %1214 = vsyncadd [#allocation6], 4294967152 }
  0x61   :  { %1215 = dma.done.wait [#allocation9], 2064  }
  0x62   :  { %1216 = vsyncadd [#allocation9], 4294965232 }
  0x63   :  { %1217 = dma.done.wait [#allocation12], 2080  }
  0x64   :  { %1218 = vsyncadd [#allocation12], 4294965216 }
  0x65   :  { %1219 = dma.done.wait [#allocation15], 16  }
  0x66   :  { %1220 = vsyncadd [#allocation15], 4294967280  ;;  %vm164_vm0 = vcmask 130048   ;;  %v980_v0 = vld [vmem:[#allocation7] sm:$0xff]   ;;  %v1340_v3 = vld [vmem:[%s1411_s0 + $0x10] sm:$0xff]  ;;  %v213_v52 = vlaneseq  ;;  %s1236_s18 = smov [#allocation16]  }
  0x67   :  { %v1330_v1 = vld [vmem:[%s1411_s0] sm:$0xff]  ;;  %v1335_v2 = vld [vmem:[%s1411_s0 + $0x8] sm:$0xff]  ;;  %940 = vmatprep.subr.bf16.mxu0 %v980_v0  ;;  %v1345_v4 = vld [vmem:[%s1411_s0 + $0x18] sm:$0xff]  ;;  %v168_v7 = vsel %vm164_vm0, %v1340_v3, 0.0  ;;  %s818_s7 = sshll.u32 %s1236_s18, 4  ;;  %s819_s7 = int_to_ptr.vmem [resolvable:$true] %s818_s7 }
  0x68   :  { %v165_v5 = vsel %vm164_vm0, %v1330_v1, 0.0  ;;  %v166_v6 = vsel %vm164_vm0, %v1335_v2, 0.0  ;;  %941 = vmatpush3.bf16.msra.mxu0 %v980_v0  ;;  %v170_v9 = vsel %vm164_vm0, %v1345_v4, 0.0  ;;  %v981_v10 = vld [vmem:[#allocation10 + $0x74] ss:$8 sps:$4 sm:$0xff]   ;;  %v1363_v53 = vshrl.u32 %v213_v52, 7  ;;  %p1196_p13 = scmp.lt.s32.totalorder %s819_s7, %s819_s7 }
  0x69   :  { %v167_v8 = vadd.f32 %v166_v6, %v165_v5  ;;  %v983_v11 = vld [vmem:[#allocation10 + $0x70] ss:$8 sps:$4 sm:$0xff]   ;;  %v984_v13 = vld [vmem:[#allocation10 + $0x64] ss:$8 sps:$4 sm:$0xff]   ;;  %468 = vmatprep.subr.bf16.mxu1 %v981_v10  ;;  %v986_v15 = vld [vmem:[#allocation10 + $0x60] ss:$8 sps:$4 sm:$0xff]  }
  0x6a   :  { %469 = vmatpush1.bf16.msra.mxu1 %v983_v11  ;;  %v987_v16 = vld [vmem:[#allocation10 + $0x54] ss:$8 sps:$4 sm:$0xff]   ;;  %v989_v18 = vld [vmem:[#allocation10 + $0x50] ss:$8 sps:$4 sm:$0xff]   ;;  %v990_v19 = vld [vmem:[#allocation10 + $0x44] ss:$8 sps:$4 sm:$0xff]  }
  0x6b   :  { %v169_v12 = vadd.f32 %v168_v7, %v167_v8  ;;  %470 = vmatprep.subr.bf16.mxu1 %v984_v13  ;;  %v992_v22 = vld [vmem:[#allocation10 + $0x40] ss:$8 sps:$4 sm:$0xff]   ;;  %v993_v23 = vld [vmem:[#allocation10 + $0x34] ss:$8 sps:$4 sm:$0xff]   ;;  %v995_v26 = vld [vmem:[#allocation10 + $0x30] ss:$8 sps:$4 sm:$0xff]  }
  0x6c   :  { %v205_v54 = vld [vmem:[#allocation2] sm:$0x1]  ;;  %v1366_v55 = vsub.s32 0, %v1363_v53  ;;  %v209_v58 = vld [vmem:[#allocation5] sm:$0x1]  ;;  %s1191_s19 = scalar_lea.vmem %s819_s7, 256 }
  0x6d   :  { %v171_v14 = vadd.f32 %v170_v9, %v169_v12  ;;  %v996_v13 = vld [vmem:[#allocation10 + $0x24] ss:$8 sps:$4 sm:$0xff]   ;;  %p1192_p12 = scmp.ne.s32.totalorder %s819_s7, %s1191_s19  ;;  %p1197_p0 = scmp.lt.s32.totalorder %s1191_s19, %s1191_s19 }
  0x6e   :  { %471 = vmatpush1.bf16.msra.mxu1 %v986_v15  ;;  %v1235_v15 = vmov 0  }
  0x6f   :  { %v172_v17 = vrot.slane %v171_v14, 4  ;;  %472 = vmatprep.subr.bf16.mxu1 %v987_v16  ;;  %500 = vmatprep.mubr.bf16.mxu1 %v1235_v15  ;;  %v1005_v16 = vld [vmem:[#allocation13 + $0x78] sm:$0xff]   ;;  %p1198_p1 = por %p1197_p0, %p1196_p13 }
  0x70   :  { %902 = vmatprep.subr.bf16.mxu0 %v1005_v16 }
  0x71   :  { %v173_v20 = vadd.f32 %v172_v17, %v171_v14  ;;  %v1004_v14 = vld [vmem:[#allocation10] ss:$8 sps:$4 sm:$0xff]   ;;  %p1199_p2 = pnand %p1198_p1, %p1192_p12 }
  0x72   :  { %473 = vmatpush1.bf16.msra.mxu1 %v989_v18  ;;  %v1006_v17 = vld [vmem:[#allocation13 + $0x38] sm:$0xff]   ;;  %v1007_v18 = vld [vmem:[#allocation13 + $0x70] sm:$0xff]  }
  0x73   :  { %v174_v21 = vrot.slane %v173_v20, 2  ;;  %474 = vmatprep.subr.bf16.mxu1 %v990_v19  ;;  %v1008_v19 = vld [vmem:[#allocation13 + $0x30] sm:$0xff]  }
  0x75   :  { %v175_v24 = vadd.f32 %v174_v21, %v173_v20  ;;  %v1009_v20 = vld [vmem:[#allocation13 + $0x68] sm:$0xff]  }
  0x76   :  { %475 = vmatpush1.bf16.msra.mxu1 %v992_v22  ;;  %v1010_v21 = vld [vmem:[#allocation13 + $0x28] sm:$0xff]   ;;  %v1011_v22 = vld [vmem:[#allocation13 + $0x60] sm:$0xff]  }
  0x77   :  { %v176_v25 = vrot.slane %v175_v24, 1  ;;  %476 = vmatprep.subr.bf16.mxu1 %v993_v23  ;;  %v1012_v23 = vld [vmem:[#allocation13 + $0x20] sm:$0xff]  }
  0x79   :  { %v177_v27 = vadd.f32 %v176_v25, %v175_v24  ;;  %v1013_v24 = vld [vmem:[#allocation13 + $0x58] sm:$0xff]  }
  0x7a   :  { %477 = vmatpush1.bf16.msra.mxu1 %v995_v26  ;;  %v1014_v25 = vld [vmem:[#allocation13 + $0x18] sm:$0xff]  }
  0x7b   :  { %v178_v28 = vmul.f32 0.03125, %v177_v27  ;;  %478 = vmatprep.subr.bf16.mxu1 %v996_v13 }
  0x7d   :  { %v179_v29 = vsub.f32 %v1330_v1, %v178_v28  ;;  %v180_v30 = vsub.f32 %v1335_v2, %v178_v28  ;;  %v181_v31 = vsub.f32 %v1340_v3, %v178_v28  ;;  %v182_v32 = vsub.f32 %v1345_v4, %v178_v28 }
  0x7f   :  { %v183_v33 = vmul.f32 %v179_v29, %v179_v29  ;;  %v184_v34 = vmul.f32 %v180_v30, %v180_v30  ;;  %v185_v35 = vmul.f32 %v181_v31, %v181_v31  ;;  %v186_v36 = vmul.f32 %v182_v32, %v182_v32 }
  0x81   :  { %v191_v37 = vsel %vm164_vm0, %v183_v33, 0.0  ;;  %v192_v38 = vsel %vm164_vm0, %v184_v34, 0.0  ;;  %v194_v39 = vsel %vm164_vm0, %v185_v35, 0.0  ;;  %v196_v41 = vsel %vm164_vm0, %v186_v36, 0.0 }
  0x82   :  { %v193_v40 = vadd.f32 %v192_v38, %v191_v37 }
  0x84   :  { %v195_v42 = vadd.f32 %v194_v39, %v193_v40 }
  0x86   :  { %v197_v43 = vadd.f32 %v196_v41, %v195_v42  ;;  %v1015_v41 = vld [vmem:[#allocation13 + $0x50] sm:$0xff]  }
  0x87   :  { %v1016_v42 = vld [vmem:[#allocation13 + $0x10] sm:$0xff]  }
  0x88   :  { %v198_v44 = vrot.slane %v197_v43, 4 }
  0x8a   :  { %v199_v45 = vadd.f32 %v198_v44, %v197_v43  ;;  %v1017_v43 = vld [vmem:[#allocation13 + $0x48] sm:$0xff]  }
  0x8b   :  { %v1018_v44 = vld [vmem:[#allocation13 + $0x8] sm:$0xff]  }
  0x8c   :  { %v200_v46 = vrot.slane %v199_v45, 2 }
  0x8e   :  { %v201_v47 = vadd.f32 %v200_v46, %v199_v45  ;;  %v1019_v45 = vld [vmem:[#allocation13 + $0x40] sm:$0xff]  }
  0x8f   :  { %v1020_v46 = vld [vmem:[#allocation13] sm:$0xff]  }
  0x90   :  { %v202_v48 = vrot.slane %v201_v47, 1 }
  0x92   :  { %v203_v49 = vadd.f32 %v202_v48, %v201_v47  ;;  %v1021_v47 = vld [vmem:[%s1420_s9 + $0x38] sm:$0xff]   ;;  %v1022_v48 = vld [vmem:[%s1420_s9 + $0x30] sm:$0xff]  }
  0x94   :  { %v204_v50 = vmul.f32 0.03125, %v203_v49  ;;  %v1023_v49 = vld [vmem:[%s1420_s9 + $0x28] sm:$0xff]  }
  0x96   :  { %v206_v51 = vadd.f32 1e-05, %v204_v50  ;;  %v384_v50 = vsub.s32 1, %v1363_v53 }
  0x98   :  { %1029 = vrsqrt.f32 %v206_v51  ;;  %v251_v51 = vld [vmem:[#allocation11] sm:$0x3] }
  0xa5   :  { %v1030_v56 = vpop.eup %1029 }
  0xa6   :  { %v208_v57 = vmul.f32 %v1030_v56, %v205_v54  ;;  %v385_v54 = vrot.slane %v251_v51, %v384_v50  ;;  %v381_v56 = vrot.slane %v251_v51, %v1366_v55 }
  0xa8   :  { %v210_v59 = vmul.f32 %v208_v57, %v178_v28  ;;  %v216_v60 = vrot.slane %v208_v57, %v1366_v55  ;;  %v834_v28 = vld [vmem:[#allocation8] ss:$0 sm:$0xff] }
  0xaa   :  { %v211_v61 = vsub.f32 %v209_v58, %v210_v59  ;;  %v218_v62 = vmul.f32 %v216_v60, %v1330_v1  ;;  %v219_v63 = vmul.f32 %v216_v60, %v1335_v2  ;;  %v220_v0 = vmul.f32 %v216_v60, %v1340_v3  ;;  %v998_v1 = vld [vmem:[#allocation10 + $0x20] ss:$8 sps:$4 sm:$0xff]   ;;  %v999_v2 = vld [vmem:[#allocation10 + $0x14] ss:$8 sps:$4 sm:$0xff]   ;;  %v1001_v3 = vld [vmem:[#allocation10 + $0x10] ss:$8 sps:$4 sm:$0xff]  }
  0xab   :  { %v221_v5 = vmul.f32 %v216_v60, %v1345_v4  ;;  %479 = vmatpush1.bf16.msra.mxu1 %v998_v1  ;;  %v1002_v4 = vld [vmem:[#allocation10 + $0x4] ss:$8 sps:$4 sm:$0xff]  }
  0xac   :  { %v226_v6 = vrot.slane %v211_v61, %v1366_v55  ;;  %480 = vmatprep.subr.bf16.mxu1 %v999_v2 }
  0xae   :  { %v228_v7 = vadd.f32 %v226_v6, %v218_v62  ;;  %v229_v8 = vadd.f32 %v226_v6, %v219_v63  ;;  %v230_v9 = vadd.f32 %v226_v6, %v220_v0  ;;  %v231_v10 = vadd.f32 %v226_v6, %v221_v5 }
  0xaf   :  { %481 = vmatpush1.bf16.msra.mxu1 %v1001_v3 }
  0xb0   :  { %v302_v11 = vpack.c.bf16 %v229_v8, %v228_v7  ;;  %v303_v12 = vpack.c.bf16 %v231_v10, %v230_v9  ;;  %482 = vmatprep.subr.bf16.mxu1 %v1002_v4 }
  0xb2   :  { %942 = vmatprep.mubr.msk.bf16.mxu0 %vm164_vm0, %v302_v11 }
  0xb3   :  { %943 = vmatmul.mubr.msk.bf16.vlgmr.msra.gmra.mxu0 %vm164_vm0, %v303_v12  ;;  %483 = vmatpush1.bf16.msra.mxu1 %v1004_v14 }
  0xb4   :  { %903 = vmatpush3.bf16.msra.mxu0 %v1006_v17  ;;  %946 = vmatprep.subr.bf16.mxu1 %v1021_v47 }
  0xb5   :  { %904 = vmatprep.subr.bf16.mxu0 %v1007_v18  ;;  %v1024_v18 = vld [vmem:[%s1420_s9 + $0x20] sm:$0xff]  }
  0xb8   :  { %905 = vmatpush3.bf16.msra.mxu0 %v1008_v19  ;;  %v1025_v19 = vld [vmem:[%s1420_s9 + $0x18] sm:$0xff]  }
  0xb9   :  { %906 = vmatprep.subr.bf16.mxu0 %v1009_v20  ;;  %v1026_v20 = vld [vmem:[%s1420_s9 + $0x10] sm:$0xff]  }
  0xbc   :  { %907 = vmatpush3.bf16.msra.mxu0 %v1010_v21  ;;  %v1027_v21 = vld [vmem:[%s1420_s9 + $0x8] sm:$0xff]  }
  0xbd   :  { %908 = vmatprep.subr.bf16.mxu0 %v1011_v22  ;;  %v1028_v22 = vld [vmem:[%s1420_s9] sm:$0xff]  }
  0xc0   :  { %909 = vmatpush3.bf16.msra.mxu0 %v1012_v23 }
  0xc1   :  { %910 = vmatprep.subr.bf16.mxu0 %v1013_v24 }
  0xc4   :  { %911 = vmatpush3.bf16.msra.mxu0 %v1014_v25 }
  0xc5   :  { %912 = vmatprep.subr.bf16.mxu0 %v1015_v41 }
  0xc8   :  { %913 = vmatpush3.bf16.msra.mxu0 %v1016_v42 }
  0xc9   :  { %914 = vmatprep.subr.bf16.mxu0 %v1017_v43 }
  0xcc   :  { %915 = vmatpush3.bf16.msra.mxu0 %v1018_v44 }
  0xcd   :  { %916 = vmatprep.subr.bf16.mxu0 %v1019_v45 }
  0xd0   :  { %917 = vmatpush3.bf16.msra.mxu0 %v1020_v46 }
 0x173   :  { %v944_v26 = vpop.f32.mrf.mxu0 }
 0x174   :  { %v365_v37 = vadd.f32 %v944_v26, %v834_v28  ;;  %v854_v26 = vld [vmem:[#allocation14] ss:$0 sm:$0xff] }
 0x175   :  { %v356_v27 = vpop.f32.mrf.mxu0 }
 0x176   :  { %v357_v30 = vadd.f32 %v834_v28, %v356_v27  ;;  %v373_v39 = vmax.f32 %v365_v37, 0.0 }
 0x177   :  { %v945_v29 = vpop.f32.mrf.mxu0 }
 0x178   :  { %v371_v33 = vmax.f32 %v357_v30, 0.0  ;;  %v368_v35 = vadd.f32 %v945_v29, %v834_v28 }
 0x179   :  { %v359_v31 = vpop.f32.mrf.mxu0 }
 0x17a   :  { %v360_v32 = vadd.f32 %v834_v28, %v359_v31  ;;  %v374_v38 = vmax.f32 %v368_v35, 0.0 }
 0x17c   :  { %v372_v34 = vmax.f32 %v360_v32, 0.0  ;;  %v376_v40 = vpack.c.bf16 %v374_v38, %v373_v39 }
 0x17e   :  { %v375_v36 = vpack.c.bf16 %v372_v34, %v371_v33 }
 0x180   :  { %501 = vmatmul.mubr.bf16.vlgmr.msra.gmra.mxu1 %v375_v36 }
 0x181   :  { %510 = vmatprep.mubr.bf16.mxu1 %v1235_v15  ;;  %947 = vmatpush3.bf16.msra.mxu1 %v1021_v47  ;;  %v871_v47 = vld [vmem:[%s1421_s10] ss:$0 sm:$0xff] }
 0x182   :  { %948 = vmatprep.subr.bf16.mxu1 %v1022_v48 }
 0x185   :  { %949 = vmatpush3.bf16.msra.mxu1 %v1022_v48 }
 0x186   :  { %950 = vmatprep.subr.bf16.mxu1 %v1023_v49 }
 0x188   :  { %511 = vmatmul.mubr.bf16.gmra.mxu1 %v376_v40 }
 0x189   :  { %951 = vmatpush3.bf16.msra.mxu1 %v1023_v49 }
 0x18a   :  { %952 = vmatprep.subr.bf16.mxu1 %v1024_v18 }
 0x18d   :  { %953 = vmatpush3.bf16.msra.mxu1 %v1024_v18 }
 0x18e   :  { %954 = vmatprep.subr.bf16.mxu1 %v1025_v19 }
 0x191   :  { %955 = vmatpush3.bf16.msra.mxu1 %v1025_v19 }
 0x192   :  { %956 = vmatprep.subr.bf16.mxu1 %v1026_v20 }
 0x195   :  { %957 = vmatpush3.bf16.msra.mxu1 %v1026_v20 }
 0x196   :  { %958 = vmatprep.subr.bf16.mxu1 %v1027_v21 }
 0x199   :  { %959 = vmatpush3.bf16.msra.mxu1 %v1027_v21 }
 0x19a   :  { %960 = vmatprep.subr.bf16.mxu1 %v1028_v22 }
 0x19d   :  { %961 = vmatpush3.bf16.msra.mxu1 %v1028_v22 }
 0x240   :  { %v502_v52 = vpop.f32.mrf.mxu1 }
 0x241   :  { %v503_v61 = vadd.f32 %v502_v52, %v381_v56 }
 0x242   :  { %v504_v57 = vpop.f32.mrf.mxu1 }
 0x243   :  { %v505_v59 = vadd.f32 %v504_v57, %v385_v54  ;;  %v521_v8 = vmax.f32 %v503_v61, 0.0 }
 0x244   :  { %v506_v58 = vpop.f32.mrf.mxu1 }
 0x245   :  { %v507_v60 = vadd.f32 %v506_v58, %v381_v56  ;;  %v522_v6 = vmax.f32 %v505_v59, 0.0 }
 0x246   :  { %v508_v62 = vpop.f32.mrf.mxu1 }
 0x247   :  { %v509_v63 = vadd.f32 %v508_v62, %v385_v54  ;;  %v523_v0 = vmax.f32 %v507_v60, 0.0 }
 0x248   :  { %v512_v5 = vpop.f32.mrf.mxu1 }
 0x249   :  { %v524_v7 = vmax.f32 %v509_v63, 0.0  ;;  %v529_v53 = vpack.c.bf16 %v523_v0, %v521_v8  ;;  %v513_v55 = vadd.f32 %v512_v5, %v381_v56 }
 0x24a   :  { %v514_v9 = vpop.f32.mrf.mxu1 }
 0x24b   :  { %v530_v10 = vpack.c.bf16 %v524_v7, %v522_v6  ;;  %v515_v12 = vadd.f32 %v514_v9, %v385_v54  ;;  %v525_v15 = vmax.f32 %v513_v55, 0.0 }
 0x24c   :  { %v516_v11 = vpop.f32.mrf.mxu1 }
 0x24d   :  { %v517_v13 = vadd.f32 %v516_v11, %v381_v56  ;;  %667 = vmatprep.mubr.bf16.mxu0 %v530_v10  ;;  %v526_v4 = vmax.f32 %v515_v12, 0.0 }
 0x24e   :  { %v518_v1 = vpop.f32.mrf.mxu1  ;;  %668 = vmatmul.mubr.bf16.vlgmr.msra.gmra.mxu0 %v529_v53 }
 0x24f   :  { %v519_v2 = vadd.f32 %v518_v1, %v385_v54  ;;  %v527_v3 = vmax.f32 %v517_v13, 0.0 }
 0x251   :  { %v528_v14 = vmax.f32 %v519_v2, 0.0  ;;  %v531_v17 = vpack.c.bf16 %v527_v3, %v525_v15 }
 0x253   :  { %v532_v16 = vpack.c.bf16 %v528_v14, %v526_v4 }
 0x255   :  { %675 = vmatprep.mubr.bf16.mxu0 %v532_v16 }
 0x256   :  { %676 = vmatmul.mubr.bf16.gmra.mxu0 %v531_v17 }
 0x30e   :  { %v918_v23 = vpop.f32.mrf.mxu0 }
 0x310   :  { %v919_v24 = vpop.f32.mrf.mxu0 }
 0x311   :  { %v920_v25 = vadd.f32 %v919_v24, %v918_v23 }
 0x312   :  { %v921_v27 = vpop.f32.mrf.mxu0 }
 0x313   :  { %v670_v29 = vadd.f32 %v920_v25, %v854_v26 }
 0x314   :  { %v922_v28 = vpop.f32.mrf.mxu0 }
 0x315   :  { %v923_v30 = vadd.f32 %v922_v28, %v921_v27  ;;  %v684_v34 = vmax.f32 %v670_v29, 0.0 }
 0x316   :  { %v924_v31 = vpop.f32.mrf.mxu0 }
 0x317   :  { %v673_v32 = vadd.f32 %v923_v30, %v854_v26 }
 0x318   :  { %v925_v33 = vpop.f32.mrf.mxu0 }
 0x319   :  { %v685_v35 = vmax.f32 %v673_v32, 0.0  ;;  %v926_v36 = vadd.f32 %v925_v33, %v924_v31 }
 0x31a   :  { %v927_v37 = vpop.f32.mrf.mxu0 }
 0x31b   :  { %v688_v38 = vpack.c.bf16 %v685_v35, %v684_v34  ;;  %v678_v40 = vadd.f32 %v926_v36, %v854_v26 }
 0x31c   :  { %v928_v39 = vpop.f32.mrf.mxu0 }
 0x31d   :  { %v929_v41 = vadd.f32 %v928_v39, %v927_v37  ;;  %962 = vmatprep.mubr.bf16.mxu1 %v688_v38  ;;  %v686_v43 = vmax.f32 %v678_v40, 0.0 }
 0x31f   :  { %v681_v42 = vadd.f32 %v929_v41, %v854_v26 }
 0x321   :  { %v687_v44 = vmax.f32 %v681_v42, 0.0 }
 0x323   :  { %v689_v45 = vpack.c.bf16 %v687_v44, %v686_v43 }
 0x325   :  { %963 = vmatmul.mubr.bf16.vlgmr.msra.gmra.mxu1 %v689_v45 }
 0x3e5   :  { %v964_v46 = vpop.f32.mrf.mxu1 }
 0x3e6   :  { %v787_v50 = vadd.f32 %v964_v46, %v871_v47 }
 0x3e7   :  { %v778_v48 = vpop.f32.mrf.mxu1 }
 0x3e8   :  { %v779_v54 = vadd.f32 %v871_v47, %v778_v48 }
 0x3e9   :  { %v965_v49 = vpop.f32.mrf.mxu1 }
 0x3ea   :  { %v790_v51 = vadd.f32 %v965_v49, %v871_v47 }
 0x3eb   :  { %v781_v52 = vpop.f32.mrf.mxu1 }
 0x3ec   :  { %v896_v56 = vpack.c.bf16 %v790_v51, %v787_v50  ;;  %v782_v57 = vadd.f32 %v871_v47, %v781_v52 }
 0x3ee   :  { %898 = vst [vmem:[#allocation16 + $0x8] sm:$0xff] %v896_v56   ;;  %v891_v58 = vpack.c.bf16 %v782_v57, %v779_v54 }
 0x3f0   :  { %892 = vst [vmem:[#allocation16] sm:$0xff] %v891_v58  }
 0x3f1   :  { %1202 = shalt.err (!%p1199_p2)
}
 0x3f2   :  { %824 = dma.vmem_to_hbm [thread:$0]  %s819_s7, 256, %s1422_s11, [#allocation4], %s1228_s6, %s1228_s6, %s1229_s22  }
 0x3f3   :  { %1221 = dma.done.wait [#allocation4], 256  }
 0x3f4   :  { %1222 = vsyncadd [#allocation4], 4294967040 }
 0x3f5   :  { %828 = vsyncpa [#allocation3], 1 }
 0x3f6   :  { %829 = vsyncpa [#allocation6], 1 }
 0x3f7   :  { %830 = vsyncpa [#allocation9], 1 }
 0x3f8   :  { %831 = vsyncpa [#allocation12], 1 }
 0x3f9   :  { %832 = vsyncpa [#allocation15], 1 }
 0x3fa   :  { %833 = vsyncpa [#allocation4], 1 }

</bundles_post_ra>
